<compile_context>
chip_gen: v5e
topology: v5e:2x2
jax: 0.10.0
libtpu: 0.0.40
codegen_flags: <defaults>
</compile_context>

<pallas_src>
import functools

import jax
import jax.numpy as jnp
import numpy as np
from jax.experimental import pallas as pl
from jax.experimental.pallas import tpu as pltpu

N_GRAPHEME = 168
N_VOWEL = 11
N_CONSONANT = 7
N_TOTAL = N_GRAPHEME + N_VOWEL + N_CONSONANT          # 186
N_PAD = ((N_TOTAL + 127) // 128) * 128                # 256 (lane-aligned)

_HEADS = (
    (0, N_GRAPHEME),
    (N_GRAPHEME, N_VOWEL),
    (N_GRAPHEME + N_VOWEL, N_CONSONANT),
)


def _head_partials(logits, col_iota, label, start, n, valid):
    """Per-head CE sum and correct-prediction count over one batch tile.

    logits:   [TB, N_PAD] f32 (columns >= N_TOTAL are zero bias, never selected)
    col_iota: [TB, N_PAD] i32 shared column iota
    label:    [TB, 1] i32 head-local label
    valid:    [TB, 1] bool (True for real rows, False for ragged-tile padding)
    """
    head_mask = (col_iota >= start) & (col_iota < start + n)
    lg = jnp.where(head_mask, logits, -jnp.inf)
    m = jnp.max(lg, axis=1, keepdims=True)                                # [TB, 1]
    ssum = jnp.sum(jnp.where(head_mask, jnp.exp(logits - m), 0.0),
                   axis=1, keepdims=True)
    lse = jnp.log(ssum) + m                                               # [TB, 1]
    tgt = label + start                                                   # global column
    label_logit = jnp.sum(jnp.where(col_iota == tgt, logits, 0.0),
                          axis=1, keepdims=True)
    # jnp.where (not multiply) so garbage rows (inf/NaN) cannot leak into sums.
    ce_sum = jnp.sum(jnp.where(valid, lse - label_logit, 0.0))
    # First-index argmax within the head (torch.argmax tie-break semantics);
    # masked / padded columns are -inf and can never equal m.
    pred_col = jnp.min(jnp.where(lg == m, col_iota, N_PAD),
                       axis=1, keepdims=True)
    correct = jnp.sum(jnp.where(valid & (pred_col == tgt), 1.0, 0.0))
    return ce_sum, correct


def _bengali_kernel(x_ref, w_ref, b_ref, y_ref, pred_ref, part_ref,
                    *, batch, tile_b, pool_chunk):
    # --- predictor: global average pool over native NCHW tile -----------------
    # f32 accumulation over static H chunks: never materializes a full-tile f32
    # cast of a bf16 input (keeps VMEM working set ~halved for the compute stage).
    tb, c, h, w = x_ref.shape
    pooled = jnp.zeros((tb, c), jnp.float32)
    n_full = h // pool_chunk
    for ci in range(n_full):
        blk32 = x_ref[:, :, ci * pool_chunk:(ci + 1) * pool_chunk, :].astype(
            jnp.float32)                                   # [TB, C, ch, W] chunk only
        pooled = pooled + blk32.sum(axis=3).sum(axis=2)    # lane reduce, then last-axis
    if n_full * pool_chunk < h:                            # defensive tail (unused: ch | H)
        blk32 = x_ref[:, :, n_full * pool_chunk:, :].astype(jnp.float32)
        pooled = pooled + blk32.sum(axis=3).sum(axis=2)

    # --- linear head on the MXU (1/HW mean scale folded into w in the wrapper) ---
    logits = jnp.dot(pooled, w_ref[...],
                     preferred_element_type=jnp.float32) + b_ref[...]     # [TB, 256]
    pred_ref[...] = logits.astype(pred_ref.dtype)

    # --- per-head cross entropy + accuracy partial sums ---
    y = y_ref[...]                                      # [TB, 3] i32
    col_iota = jax.lax.broadcasted_iota(jnp.int32, logits.shape, 1)
    row_ids = (jax.lax.broadcasted_iota(jnp.int32, (tile_b, 1), 0)
               + pl.program_id(0) * tile_b)
    valid = row_ids < batch                             # mask ragged-tile rows

    ces, cors = [], []
    for col, (start, n) in enumerate(_HEADS):
        ce, cor = _head_partials(logits, col_iota, y[:, col:col + 1],
                                 start, n, valid)
        ces.append(ce)
        cors.append(cor)
    vals = ces + cors + [jnp.sum(jnp.where(valid, 1.0, 0.0))]   # 7 scalars

    # Pack [ce_g, ce_v, ce_c, cor_g, cor_v, cor_c, n_valid] into columns 0..6 of
    # a lane-dense (8, 128) block: one unmasked store per tile (wrapper reads row 0).
    col128 = jax.lax.broadcasted_iota(jnp.int32, (8, 128), 1)
    packed = jnp.zeros((8, 128), jnp.float32)
    for idx, v in enumerate(vals):
        packed = jnp.where(col128 == idx, v, packed)
    part_ref[...] = packed


def _vmem_capacity_bytes():
    """Physical VMEM per TensorCore; conservative (v7x, 64 MiB) fallback."""
    try:
        return int(pltpu.get_tpu_info().vmem_capacity_bytes)
    except Exception:
        return 64 << 20


def _pool_chunk_rows(h, bytes_per_h_row, budget=2 << 20):
    """Largest divisor of H whose per-chunk f32 pooling temp fits `budget`,
    while keeping the (statically unrolled) chunk loop reasonably short."""
    divisors = [d for d in range(1, h + 1) if h % d == 0]
    fitting = [d for d in divisors if d * bytes_per_h_row <= budget]
    ch = max(fitting) if fitting else 1
    while h // ch > 16:
        bigger = [d for d in divisors if d > ch]
        if not bigger:
            break
        ch = min(bigger)
    return ch


def _plan_tiling(batch, c, h, w, itemsize):
    """Generation-aware batch tile, pooling chunk, and scoped-VMEM limit."""
    cap = _vmem_capacity_bytes()
    if cap >= (100 << 20):          # v5e / v6e: 128 MiB physical VMEM
        vmem_limit = 96 << 20
        x_budget = 24 << 20         # per x buffer (double-buffered)
    else:                           # v7x: 64 MiB per TensorCore
        vmem_limit = 48 << 20
        x_budget = 12 << 20

    per_row_x = max(1, c * h * w * itemsize)
    if batch <= 8:
        tb = batch                  # block == full batch dim: no ragged rows at all
    else:
        tb = min(256, max(8, (x_budget // per_row_x) // 8 * 8))
        tb = min(tb, ((batch + 7) // 8) * 8)

    def need(tb_, ch_):
        x_tile = tb_ * per_row_x                      # native-dtype x tile
        pool_tmp = tb_ * c * ch_ * w * 4              # f32 pooling chunk temp
        wb = c * N_PAD * 4 + 128 * 4                  # padded weight + bias
        y_tile = tb_ * 128 * 4                        # (TB, 3) i32, lane-padded
        pred_tile = tb_ * N_PAD * 4
        part = 8 * 128 * 4
        softmax_tmp = 6 * tb_ * N_PAD * 4             # iota / masked / exp temporaries
        return (2 * x_tile + 2 * wb + 2 * y_tile + 2 * pred_tile + 2 * part
                + pool_tmp + tb_ * c * 4 + softmax_tmp)

    ch = _pool_chunk_rows(h, tb * c * w * 4)
    while tb > 8 and need(tb, ch) > int(0.85 * vmem_limit):
        tb -= 8
        ch = _pool_chunk_rows(h, tb * c * w * 4)
    return tb, ch, vmem_limit


def bengali_classifier_forward(x, y, w, b):
    """Pallas implementation of BengaliClassifier.forward(x, y).

    x: [B, C, H, W] backbone feature map (NCHW, any float dtype, consumed natively)
    y: [B, 3] integer labels (grapheme, vowel, consonant)
    w: [C, 186] head weight, b: [186] head bias
    Returns (loss, metrics, pred) like the PyTorch module.
    """
    B, C, H, W = x.shape
    HW = H * W

    TB, pool_chunk, vmem_limit = _plan_tiling(B, C, H, W, x.dtype.itemsize)
    num_tiles = pl.cdiv(B, TB)

    y_i32 = y.astype(jnp.int32)

    # Fold the 1/HW mean scale into the weights; zero-pad 186 -> 256 lanes.
    w_pad = jnp.pad(w.astype(jnp.float32) / np.float32(HW),
                    ((0, 0), (0, N_PAD - N_TOTAL)))
    b_pad = jnp.pad(b.astype(jnp.float32),
                    (0, N_PAD - N_TOTAL)).reshape(1, N_PAD)

    kernel = functools.partial(_bengali_kernel, batch=B, tile_b=TB,
                               pool_chunk=pool_chunk)

    itemsize = x.dtype.itemsize
    x_bytes = B * C * HW * itemsize
    cost = pl.CostEstimate(
        flops=int(B * C * HW + 2 * B * C * N_PAD + 20 * B * N_PAD),
        transcendentals=int(3 * B * N_PAD),
        bytes_accessed=int(x_bytes + C * N_PAD * 4 + N_PAD * 4 + B * 3 * 4
                           + B * N_PAD * itemsize + num_tiles * 8 * 128 * 4),
    )

    pred_pad, partials = pl.pallas_call(
        kernel,
        out_shape=(
            jax.ShapeDtypeStruct((B, N_PAD), x.dtype),                # padded logits
            jax.ShapeDtypeStruct((num_tiles * 8, 128), jnp.float32),  # metric partials
        ),
        grid=(num_tiles,),
        in_specs=[
            pl.BlockSpec((TB, C, H, W), lambda i: (i, 0, 0, 0)),      # x tile (native NCHW)
            pl.BlockSpec((C, N_PAD), lambda i: (0, 0)),               # w (resident)
            pl.BlockSpec((1, N_PAD), lambda i: (0, 0)),               # b (resident)
            pl.BlockSpec((TB, 3), lambda i: (i, 0)),                  # labels tile
        ],
        out_specs=(
            pl.BlockSpec((TB, N_PAD), lambda i: (i, 0)),
            pl.BlockSpec((8, 128), lambda i: (i, 0)),
        ),
        compiler_params=pltpu.CompilerParams(
            dimension_semantics=("parallel",),
            vmem_limit_bytes=int(vmem_limit),
        ),
        cost_estimate=cost,
    )(x, w_pad, b_pad, y_i32)

    pred = pred_pad[:, :N_TOTAL]

    sums = partials.reshape(num_tiles, 8, 128)[:, 0, :8].sum(axis=0)   # [8]
    count = sums[6]
    loss_g, loss_v, loss_c = sums[0] / count, sums[1] / count, sums[2] / count
    acc_g, acc_v, acc_c = sums[3] / count, sums[4] / count, sums[5] / count
    loss = loss_g + loss_v + loss_c
    metrics = {
        "loss": loss,
        "loss_grapheme": loss_g,
        "loss_vowel": loss_v,
        "loss_consonant": loss_c,
        "acc_grapheme": acc_g,
        "acc_vowel": acc_v,
        "acc_consonant": acc_c,
    }
    return loss, metrics, pred


def _reference_forward(x, y, w, b):
    """Pure-JAX reference for correctness checking."""
    B, C, H, W = x.shape
    pooled = jnp.mean(x.reshape(B, C, H * W), axis=2)
    logits = pooled @ w + b[None, :]
    splits = [(0, N_GRAPHEME), (N_GRAPHEME, N_VOWEL),
              (N_GRAPHEME + N_VOWEL, N_CONSONANT)]
    losses, accs = [], []
    for col, (s, n) in enumerate(splits):
        lg = logits[:, s:s + n]
        lbl = y[:, col]
        logp = lg - jax.scipy.special.logsumexp(lg, axis=1, keepdims=True)
        losses.append(-jnp.mean(logp[jnp.arange(B), lbl]))
        accs.append(jnp.mean((jnp.argmax(lg, axis=1) == lbl).astype(jnp.float32)))
    return sum(losses), losses, accs, logits


if __name__ == "__main__":
    B, C, H, W = 2, 4, 16, 16

    key = jax.random.PRNGKey(0)
    kx, kw, kb, kg, kv, kc = jax.random.split(key, 6)

    x = jax.random.normal(kx, (B, C, H, W), dtype=jnp.float32)
    w = jax.random.normal(kw, (C, N_TOTAL), dtype=jnp.float32) * 0.1
    b = jax.random.normal(kb, (N_TOTAL,), dtype=jnp.float32) * 0.01
    y = jnp.stack(
        [
            jax.random.randint(kg, (B,), 0, N_GRAPHEME),
            jax.random.randint(kv, (B,), 0, N_VOWEL),
            jax.random.randint(kc, (B,), 0, N_CONSONANT),
        ],
        axis=1,
    ).astype(jnp.int32)                                   # [B, 3]

    loss, metrics, pred = bengali_classifier_forward(x, y, w, b)
    jax.block_until_ready((loss, metrics, pred))

    # Sanity-check against a pure-JAX reference.
    ref_loss, ref_losses, ref_accs, ref_logits = _reference_forward(x, y, w, b)
    np.testing.assert_allclose(np.asarray(pred), np.asarray(ref_logits),
                               rtol=1e-4, atol=1e-4)
    np.testing.assert_allclose(float(loss), float(ref_loss), rtol=1e-4, atol=1e-4)
    np.testing.assert_allclose(float(metrics["loss_grapheme"]), float(ref_losses[0]),
                               rtol=1e-4, atol=1e-4)
    np.testing.assert_allclose(float(metrics["loss_vowel"]), float(ref_losses[1]),
                               rtol=1e-4, atol=1e-4)
    np.testing.assert_allclose(float(metrics["loss_consonant"]), float(ref_losses[2]),
                               rtol=1e-4, atol=1e-4)
    np.testing.assert_allclose(float(metrics["acc_grapheme"]), float(ref_accs[0]),
                               rtol=1e-5, atol=1e-5)
    np.testing.assert_allclose(float(metrics["acc_vowel"]), float(ref_accs[1]),
                               rtol=1e-5, atol=1e-5)
    np.testing.assert_allclose(float(metrics["acc_consonant"]), float(ref_accs[2]),
                               rtol=1e-5, atol=1e-5)

    print("KERNEL_OK")
</pallas_src>

<mosaic_0001>
module attributes {stable_mosaic.version = 11 : i64} {
  func.func @_bengali_kernel(%arg0: i32, %arg1: memref<2x4x16x16xf32, #tpu.memory_space<vmem>>, %arg2: memref<4x256xf32, #tpu.memory_space<vmem>>, %arg3: memref<1x256xf32, #tpu.memory_space<vmem>>, %arg4: memref<2x3xi32, #tpu.memory_space<vmem>>, %arg5: memref<2x256xf32, #tpu.memory_space<vmem>>, %arg6: memref<8x128xf32, #tpu.memory_space<vmem>>) attributes {dimension_semantics = [#tpu.dimension_semantics<parallel>], iteration_bounds = array<i64: 1>, scalar_prefetch = 0 : i64, scratch_operands = 0 : i64, tpu.core_type = #tpu.core_type<tc>, window_params = [{transform_indices = @transform_0, window_bounds = array<i64: 2, 4, 16, 16>}, {pipeline_mode = #tpu.pipeline_mode<synchronous>, transform_indices = @transform_1, window_bounds = array<i64: 4, 256>}, {pipeline_mode = #tpu.pipeline_mode<synchronous>, transform_indices = @transform_2, window_bounds = array<i64: 1, 256>}, {transform_indices = @transform_3, window_bounds = array<i64: 2, 3>}, {transform_indices = @transform_4, window_bounds = array<i64: 2, 256>}, {transform_indices = @transform_5, window_bounds = array<i64: 8, 128>}]} {
    %cst = arith.constant 0.000000e+00 : f32
    %0 = vector.broadcast %cst : f32 to vector<2x4xf32>
    %c0 = arith.constant 0 : index
    %c0_0 = arith.constant 0 : index
    %c0_1 = arith.constant 0 : index
    %c0_2 = arith.constant 0 : index
    %1 = vector.load %arg1[%c0, %c0_0, %c0_1, %c0_2] : memref<2x4x16x16xf32, #tpu.memory_space<vmem>>, vector<2x4x16x16xf32>
    %cst_3 = arith.constant dense<0.000000e+00> : vector<2x4x16xf32>
    %2 = vector.multi_reduction <add>, %1, %cst_3 [3] : vector<2x4x16x16xf32> to vector<2x4x16xf32>
    %cst_4 = arith.constant dense<0.000000e+00> : vector<2x4xf32>
    %3 = vector.multi_reduction <add>, %2, %cst_4 [2] : vector<2x4x16xf32> to vector<2x4xf32>
    %4 = arith.addf %0, %3 : vector<2x4xf32>
    %c0_5 = arith.constant 0 : index
    %c0_6 = arith.constant 0 : index
    %5 = vector.load %arg2[%c0_5, %c0_6] : memref<4x256xf32, #tpu.memory_space<vmem>>, vector<4x256xf32>
    %cst_7 = arith.constant dense<0.000000e+00> : vector<2x256xf32>
    %6 = tpu.matmul %4, %5, %cst_7 {dimension_numbers = #tpu.dot_dimension_numbers<[1], [0], [0], [1], [0, 0, 1, 1], [], []>} : vector<2x4xf32>, vector<4x256xf32>, vector<2x256xf32> -> vector<2x256xf32>
    %c0_8 = arith.constant 0 : index
    %c0_9 = arith.constant 0 : index
    %7 = vector.load %arg3[%c0_8, %c0_9] : memref<1x256xf32, #tpu.memory_space<vmem>>, vector<1x256xf32>
    %8 = vector.broadcast %7 : vector<1x256xf32> to vector<2x256xf32>
    %9 = arith.addf %6, %8 : vector<2x256xf32>
    %c0_10 = arith.constant 0 : index
    %c0_11 = arith.constant 0 : index
    %10 = vector.load %arg5[%c0_10, %c0_11] : memref<2x256xf32, #tpu.memory_space<vmem>>, vector<2x256xf32>
    tpu.vector_store %arg5[%c0_10, %c0_11], %9 {strides = array<i32>} : memref<2x256xf32, #tpu.memory_space<vmem>>, vector<2x256xf32>,
    %c0_12 = arith.constant 0 : index
    %c0_13 = arith.constant 0 : index
    %11 = vector.load %arg4[%c0_12, %c0_13] : memref<2x3xi32, #tpu.memory_space<vmem>>, vector<2x3xi32>
    %12 = tpu.iota {dimensions = array<i32: 1>} : vector<2x256xi32>
    %13 = tpu.iota {dimensions = array<i32: 0>} : vector<2x1xi32>
    %c2_i32 = arith.constant 2 : i32
    %14 = arith.muli %arg0, %c2_i32 : i32
    %15 = vector.broadcast %14 : i32 to vector<2x1xi32>
    %16 = arith.addi %13, %15 : vector<2x1xi32>
    %c2_i32_14 = arith.constant 2 : i32
    %17 = vector.broadcast %c2_i32_14 : i32 to vector<2x1xi32>
    %18 = arith.cmpi slt, %16, %17 : vector<2x1xi32>
    %19 = vector.extract_strided_slice %11 {offsets = [0, 0], sizes = [2, 1], strides = [1, 1]} : vector<2x3xi32> to vector<2x1xi32>
    %c0_i32 = arith.constant 0 : i32
    %20 = vector.broadcast %c0_i32 : i32 to vector<2x256xi32>
    %21 = arith.cmpi sge, %12, %20 : vector<2x256xi32>
    %c168_i32 = arith.constant 168 : i32
    %22 = vector.broadcast %c168_i32 : i32 to vector<2x256xi32>
    %23 = arith.cmpi slt, %12, %22 : vector<2x256xi32>
    %24 = arith.andi %21, %23 : vector<2x256xi1>
    %cst_15 = arith.constant 0xFF800000 : f32
    %25 = vector.broadcast %cst_15 : f32 to vector<2x256xf32>
    %26 = arith.select %24, %9, %25 : vector<2x256xi1>, vector<2x256xf32>
    %cst_16 = arith.constant dense<0xFF800000> : vector<2xf32>
    %27 = vector.multi_reduction <maximumf>, %26, %cst_16 [1] : vector<2x256xf32> to vector<2xf32>
    %28 = vector.shape_cast %27 : vector<2xf32> to vector<2x1xf32>
    %29 = vector.broadcast %28 : vector<2x1xf32> to vector<2x256xf32>
    %30 = arith.subf %9, %29 : vector<2x256xf32>
    %31 = math.exp %30 : vector<2x256xf32>
    %cst_17 = arith.constant 0.000000e+00 : f32
    %32 = vector.broadcast %cst_17 : f32 to vector<2x256xf32>
    %33 = arith.select %24, %31, %32 : vector<2x256xi1>, vector<2x256xf32>
    %cst_18 = arith.constant dense<0.000000e+00> : vector<2xf32>
    %34 = vector.multi_reduction <add>, %33, %cst_18 [1] : vector<2x256xf32> to vector<2xf32>
    %35 = vector.shape_cast %34 : vector<2xf32> to vector<2x1xf32>
    %36 = math.log %35 : vector<2x1xf32>
    %37 = arith.addf %36, %28 : vector<2x1xf32>
    %c0_i32_19 = arith.constant 0 : i32
    %38 = vector.broadcast %c0_i32_19 : i32 to vector<2x1xi32>
    %39 = arith.addi %19, %38 : vector<2x1xi32>
    %40 = vector.broadcast %39 : vector<2x1xi32> to vector<2x256xi32>
    %41 = arith.cmpi eq, %12, %40 : vector<2x256xi32>
    %cst_20 = arith.constant 0.000000e+00 : f32
    %42 = vector.broadcast %cst_20 : f32 to vector<2x256xf32>
    %43 = arith.select %41, %9, %42 : vector<2x256xi1>, vector<2x256xf32>
    %cst_21 = arith.constant dense<0.000000e+00> : vector<2xf32>
    %44 = vector.multi_reduction <add>, %43, %cst_21 [1] : vector<2x256xf32> to vector<2xf32>
    %45 = vector.shape_cast %44 : vector<2xf32> to vector<2x1xf32>
    %46 = arith.subf %37, %45 : vector<2x1xf32>
    %cst_22 = arith.constant 0.000000e+00 : f32
    %47 = vector.broadcast %cst_22 : f32 to vector<2x1xf32>
    %48 = arith.select %18, %46, %47 : vector<2x1xi1>, vector<2x1xf32>
    %49 = vector.shape_cast %48 : vector<2x1xf32> to vector<1x2x1xf32>
    %cst_23 = arith.constant dense<0.000000e+00> : vector<1xf32>
    %50 = vector.multi_reduction <add>, %49, %cst_23 [1, 2] : vector<1x2x1xf32> to vector<1xf32>
    %51 = vector.shape_cast %50 : vector<1xf32> to vector<1x1x1xf32>
    %52 = vector.extract %51[0, 0, 0] : f32 from vector<1x1x1xf32>
    %53 = vector.broadcast %28 : vector<2x1xf32> to vector<2x256xf32>
    %54 = arith.cmpf oeq, %26, %53 : vector<2x256xf32>
    %c256_i32 = arith.constant 256 : i32
    %55 = vector.broadcast %c256_i32 : i32 to vector<2x256xi32>
    %56 = arith.select %54, %12, %55 : vector<2x256xi1>, vector<2x256xi32>
    %cst_24 = arith.constant dense<2147483647> : vector<2xi32>
    %57 = vector.multi_reduction <minsi>, %56, %cst_24 [1] : vector<2x256xi32> to vector<2xi32>
    %58 = vector.shape_cast %57 : vector<2xi32> to vector<2x1xi32>
    %59 = arith.cmpi eq, %58, %39 : vector<2x1xi32>
    %60 = arith.andi %18, %59 : vector<2x1xi1>
    %cst_25 = arith.constant 1.000000e+00 : f32
    %cst_26 = arith.constant 0.000000e+00 : f32
    %61 = vector.broadcast %cst_25 : f32 to vector<2x1xf32>
    %62 = vector.broadcast %cst_26 : f32 to vector<2x1xf32>
    %63 = arith.select %60, %61, %62 : vector<2x1xi1>, vector<2x1xf32>
    %64 = vector.shape_cast %63 : vector<2x1xf32> to vector<1x2x1xf32>
    %cst_27 = arith.constant dense<0.000000e+00> : vector<1xf32>
    %65 = vector.multi_reduction <add>, %64, %cst_27 [1, 2] : vector<1x2x1xf32> to vector<1xf32>
    %66 = vector.shape_cast %65 : vector<1xf32> to vector<1x1x1xf32>
    %67 = vector.extract %66[0, 0, 0] : f32 from vector<1x1x1xf32>
    %68 = vector.extract_strided_slice %11 {offsets = [0, 1], sizes = [2, 1], strides = [1, 1]} : vector<2x3xi32> to vector<2x1xi32>
    %c168_i32_28 = arith.constant 168 : i32
    %69 = vector.broadcast %c168_i32_28 : i32 to vector<2x256xi32>
    %70 = arith.cmpi sge, %12, %69 : vector<2x256xi32>
    %c179_i32 = arith.constant 179 : i32
    %71 = vector.broadcast %c179_i32 : i32 to vector<2x256xi32>
    %72 = arith.cmpi slt, %12, %71 : vector<2x256xi32>
    %73 = arith.andi %70, %72 : vector<2x256xi1>
    %cst_29 = arith.constant 0xFF800000 : f32
    %74 = vector.broadcast %cst_29 : f32 to vector<2x256xf32>
    %75 = arith.select %73, %9, %74 : vector<2x256xi1>, vector<2x256xf32>
    %cst_30 = arith.constant dense<0xFF800000> : vector<2xf32>
    %76 = vector.multi_reduction <maximumf>, %75, %cst_30 [1] : vector<2x256xf32> to vector<2xf32>
    %77 = vector.shape_cast %76 : vector<2xf32> to vector<2x1xf32>
    %78 = vector.broadcast %77 : vector<2x1xf32> to vector<2x256xf32>
    %79 = arith.subf %9, %78 : vector<2x256xf32>
    %80 = math.exp %79 : vector<2x256xf32>
    %cst_31 = arith.constant 0.000000e+00 : f32
    %81 = vector.broadcast %cst_31 : f32 to vector<2x256xf32>
    %82 = arith.select %73, %80, %81 : vector<2x256xi1>, vector<2x256xf32>
    %cst_32 = arith.constant dense<0.000000e+00> : vector<2xf32>
    %83 = vector.multi_reduction <add>, %82, %cst_32 [1] : vector<2x256xf32> to vector<2xf32>
    %84 = vector.shape_cast %83 : vector<2xf32> to vector<2x1xf32>
    %85 = math.log %84 : vector<2x1xf32>
    %86 = arith.addf %85, %77 : vector<2x1xf32>
    %c168_i32_33 = arith.constant 168 : i32
    %87 = vector.broadcast %c168_i32_33 : i32 to vector<2x1xi32>
    %88 = arith.addi %68, %87 : vector<2x1xi32>
    %89 = vector.broadcast %88 : vector<2x1xi32> to vector<2x256xi32>
    %90 = arith.cmpi eq, %12, %89 : vector<2x256xi32>
    %cst_34 = arith.constant 0.000000e+00 : f32
    %91 = vector.broadcast %cst_34 : f32 to vector<2x256xf32>
    %92 = arith.select %90, %9, %91 : vector<2x256xi1>, vector<2x256xf32>
    %cst_35 = arith.constant dense<0.000000e+00> : vector<2xf32>
    %93 = vector.multi_reduction <add>, %92, %cst_35 [1] : vector<2x256xf32> to vector<2xf32>
    %94 = vector.shape_cast %93 : vector<2xf32> to vector<2x1xf32>
    %95 = arith.subf %86, %94 : vector<2x1xf32>
    %cst_36 = arith.constant 0.000000e+00 : f32
    %96 = vector.broadcast %cst_36 : f32 to vector<2x1xf32>
    %97 = arith.select %18, %95, %96 : vector<2x1xi1>, vector<2x1xf32>
    %98 = vector.shape_cast %97 : vector<2x1xf32> to vector<1x2x1xf32>
    %cst_37 = arith.constant dense<0.000000e+00> : vector<1xf32>
    %99 = vector.multi_reduction <add>, %98, %cst_37 [1, 2] : vector<1x2x1xf32> to vector<1xf32>
    %100 = vector.shape_cast %99 : vector<1xf32> to vector<1x1x1xf32>
    %101 = vector.extract %100[0, 0, 0] : f32 from vector<1x1x1xf32>
    %102 = vector.broadcast %77 : vector<2x1xf32> to vector<2x256xf32>
    %103 = arith.cmpf oeq, %75, %102 : vector<2x256xf32>
    %c256_i32_38 = arith.constant 256 : i32
    %104 = vector.broadcast %c256_i32_38 : i32 to vector<2x256xi32>
    %105 = arith.select %103, %12, %104 : vector<2x256xi1>, vector<2x256xi32>
    %cst_39 = arith.constant dense<2147483647> : vector<2xi32>
    %106 = vector.multi_reduction <minsi>, %105, %cst_39 [1] : vector<2x256xi32> to vector<2xi32>
    %107 = vector.shape_cast %106 : vector<2xi32> to vector<2x1xi32>
    %108 = arith.cmpi eq, %107, %88 : vector<2x1xi32>
    %109 = arith.andi %18, %108 : vector<2x1xi1>
    %cst_40 = arith.constant 1.000000e+00 : f32
    %cst_41 = arith.constant 0.000000e+00 : f32
    %110 = vector.broadcast %cst_40 : f32 to vector<2x1xf32>
    %111 = vector.broadcast %cst_41 : f32 to vector<2x1xf32>
    %112 = arith.select %109, %110, %111 : vector<2x1xi1>, vector<2x1xf32>
    %113 = vector.shape_cast %112 : vector<2x1xf32> to vector<1x2x1xf32>
    %cst_42 = arith.constant dense<0.000000e+00> : vector<1xf32>
    %114 = vector.multi_reduction <add>, %113, %cst_42 [1, 2] : vector<1x2x1xf32> to vector<1xf32>
    %115 = vector.shape_cast %114 : vector<1xf32> to vector<1x1x1xf32>
    %116 = vector.extract %115[0, 0, 0] : f32 from vector<1x1x1xf32>
    %117 = vector.extract_strided_slice %11 {offsets = [0, 2], sizes = [2, 1], strides = [1, 1]} : vector<2x3xi32> to vector<2x1xi32>
    %c179_i32_43 = arith.constant 179 : i32
    %118 = vector.broadcast %c179_i32_43 : i32 to vector<2x256xi32>
    %119 = arith.cmpi sge, %12, %118 : vector<2x256xi32>
    %c186_i32 = arith.constant 186 : i32
    %120 = vector.broadcast %c186_i32 : i32 to vector<2x256xi32>
    %121 = arith.cmpi slt, %12, %120 : vector<2x256xi32>
    %122 = arith.andi %119, %121 : vector<2x256xi1>
    %cst_44 = arith.constant 0xFF800000 : f32
    %123 = vector.broadcast %cst_44 : f32 to vector<2x256xf32>
    %124 = arith.select %122, %9, %123 : vector<2x256xi1>, vector<2x256xf32>
    %cst_45 = arith.constant dense<0xFF800000> : vector<2xf32>
    %125 = vector.multi_reduction <maximumf>, %124, %cst_45 [1] : vector<2x256xf32> to vector<2xf32>
    %126 = vector.shape_cast %125 : vector<2xf32> to vector<2x1xf32>
    %127 = vector.broadcast %126 : vector<2x1xf32> to vector<2x256xf32>
    %128 = arith.subf %9, %127 : vector<2x256xf32>
    %129 = math.exp %128 : vector<2x256xf32>
    %cst_46 = arith.constant 0.000000e+00 : f32
    %130 = vector.broadcast %cst_46 : f32 to vector<2x256xf32>
    %131 = arith.select %122, %129, %130 : vector<2x256xi1>, vector<2x256xf32>
    %cst_47 = arith.constant dense<0.000000e+00> : vector<2xf32>
    %132 = vector.multi_reduction <add>, %131, %cst_47 [1] : vector<2x256xf32> to vector<2xf32>
    %133 = vector.shape_cast %132 : vector<2xf32> to vector<2x1xf32>
    %134 = math.log %133 : vector<2x1xf32>
    %135 = arith.addf %134, %126 : vector<2x1xf32>
    %c179_i32_48 = arith.constant 179 : i32
    %136 = vector.broadcast %c179_i32_48 : i32 to vector<2x1xi32>
    %137 = arith.addi %117, %136 : vector<2x1xi32>
    %138 = vector.broadcast %137 : vector<2x1xi32> to vector<2x256xi32>
    %139 = arith.cmpi eq, %12, %138 : vector<2x256xi32>
    %cst_49 = arith.constant 0.000000e+00 : f32
    %140 = vector.broadcast %cst_49 : f32 to vector<2x256xf32>
    %141 = arith.select %139, %9, %140 : vector<2x256xi1>, vector<2x256xf32>
    %cst_50 = arith.constant dense<0.000000e+00> : vector<2xf32>
    %142 = vector.multi_reduction <add>, %141, %cst_50 [1] : vector<2x256xf32> to vector<2xf32>
    %143 = vector.shape_cast %142 : vector<2xf32> to vector<2x1xf32>
    %144 = arith.subf %135, %143 : vector<2x1xf32>
    %cst_51 = arith.constant 0.000000e+00 : f32
    %145 = vector.broadcast %cst_51 : f32 to vector<2x1xf32>
    %146 = arith.select %18, %144, %145 : vector<2x1xi1>, vector<2x1xf32>
    %147 = vector.shape_cast %146 : vector<2x1xf32> to vector<1x2x1xf32>
    %cst_52 = arith.constant dense<0.000000e+00> : vector<1xf32>
    %148 = vector.multi_reduction <add>, %147, %cst_52 [1, 2] : vector<1x2x1xf32> to vector<1xf32>
    %149 = vector.shape_cast %148 : vector<1xf32> to vector<1x1x1xf32>
    %150 = vector.extract %149[0, 0, 0] : f32 from vector<1x1x1xf32>
    %151 = vector.broadcast %126 : vector<2x1xf32> to vector<2x256xf32>
    %152 = arith.cmpf oeq, %124, %151 : vector<2x256xf32>
    %c256_i32_53 = arith.constant 256 : i32
    %153 = vector.broadcast %c256_i32_53 : i32 to vector<2x256xi32>
    %154 = arith.select %152, %12, %153 : vector<2x256xi1>, vector<2x256xi32>
    %cst_54 = arith.constant dense<2147483647> : vector<2xi32>
    %155 = vector.multi_reduction <minsi>, %154, %cst_54 [1] : vector<2x256xi32> to vector<2xi32>
    %156 = vector.shape_cast %155 : vector<2xi32> to vector<2x1xi32>
    %157 = arith.cmpi eq, %156, %137 : vector<2x1xi32>
    %158 = arith.andi %18, %157 : vector<2x1xi1>
    %cst_55 = arith.constant 1.000000e+00 : f32
    %cst_56 = arith.constant 0.000000e+00 : f32
    %159 = vector.broadcast %cst_55 : f32 to vector<2x1xf32>
    %160 = vector.broadcast %cst_56 : f32 to vector<2x1xf32>
    %161 = arith.select %158, %159, %160 : vector<2x1xi1>, vector<2x1xf32>
    %162 = vector.shape_cast %161 : vector<2x1xf32> to vector<1x2x1xf32>
    %cst_57 = arith.constant dense<0.000000e+00> : vector<1xf32>
    %163 = vector.multi_reduction <add>, %162, %cst_57 [1, 2] : vector<1x2x1xf32> to vector<1xf32>
    %164 = vector.shape_cast %163 : vector<1xf32> to vector<1x1x1xf32>
    %165 = vector.extract %164[0, 0, 0] : f32 from vector<1x1x1xf32>
    %cst_58 = arith.constant 1.000000e+00 : f32
    %cst_59 = arith.constant 0.000000e+00 : f32
    %166 = vector.broadcast %cst_58 : f32 to vector<2x1xf32>
    %167 = vector.broadcast %cst_59 : f32 to vector<2x1xf32>
    %168 = arith.select %18, %166, %167 : vector<2x1xi1>, vector<2x1xf32>
    %169 = vector.shape_cast %168 : vector<2x1xf32> to vector<1x2x1xf32>
    %cst_60 = arith.constant dense<0.000000e+00> : vector<1xf32>
    %170 = vector.multi_reduction <add>, %169, %cst_60 [1, 2] : vector<1x2x1xf32> to vector<1xf32>
    %171 = vector.shape_cast %170 : vector<1xf32> to vector<1x1x1xf32>
    %172 = vector.extract %171[0, 0, 0] : f32 from vector<1x1x1xf32>
    %173 = tpu.iota {dimensions = array<i32: 1>} : vector<8x128xi32>
    %cst_61 = arith.constant 0.000000e+00 : f32
    %174 = vector.broadcast %cst_61 : f32 to vector<8x128xf32>
    %c0_i32_62 = arith.constant 0 : i32
    %175 = vector.broadcast %c0_i32_62 : i32 to vector<8x128xi32>
    %176 = arith.cmpi eq, %173, %175 : vector<8x128xi32>
    %177 = vector.broadcast %52 : f32 to vector<8x128xf32>
    %178 = arith.select %176, %177, %174 : vector<8x128xi1>, vector<8x128xf32>
    %c1_i32 = arith.constant 1 : i32
    %179 = vector.broadcast %c1_i32 : i32 to vector<8x128xi32>
    %180 = arith.cmpi eq, %173, %179 : vector<8x128xi32>
    %181 = vector.broadcast %101 : f32 to vector<8x128xf32>
    %182 = arith.select %180, %181, %178 : vector<8x128xi1>, vector<8x128xf32>
    %c2_i32_63 = arith.constant 2 : i32
    %183 = vector.broadcast %c2_i32_63 : i32 to vector<8x128xi32>
    %184 = arith.cmpi eq, %173, %183 : vector<8x128xi32>
    %185 = vector.broadcast %150 : f32 to vector<8x128xf32>
    %186 = arith.select %184, %185, %182 : vector<8x128xi1>, vector<8x128xf32>
    %c3_i32 = arith.constant 3 : i32
    %187 = vector.broadcast %c3_i32 : i32 to vector<8x128xi32>
    %188 = arith.cmpi eq, %173, %187 : vector<8x128xi32>
    %189 = vector.broadcast %67 : f32 to vector<8x128xf32>
    %190 = arith.select %188, %189, %186 : vector<8x128xi1>, vector<8x128xf32>
    %c4_i32 = arith.constant 4 : i32
    %191 = vector.broadcast %c4_i32 : i32 to vector<8x128xi32>
    %192 = arith.cmpi eq, %173, %191 : vector<8x128xi32>
    %193 = vector.broadcast %116 : f32 to vector<8x128xf32>
    %194 = arith.select %192, %193, %190 : vector<8x128xi1>, vector<8x128xf32>
    %c5_i32 = arith.constant 5 : i32
    %195 = vector.broadcast %c5_i32 : i32 to vector<8x128xi32>
    %196 = arith.cmpi eq, %173, %195 : vector<8x128xi32>
    %197 = vector.broadcast %165 : f32 to vector<8x128xf32>
    %198 = arith.select %196, %197, %194 : vector<8x128xi1>, vector<8x128xf32>
    %c6_i32 = arith.constant 6 : i32
    %199 = vector.broadcast %c6_i32 : i32 to vector<8x128xi32>
    %200 = arith.cmpi eq, %173, %199 : vector<8x128xi32>
    %201 = vector.broadcast %172 : f32 to vector<8x128xf32>
    %202 = arith.select %200, %201, %198 : vector<8x128xi1>, vector<8x128xf32>
    %c0_64 = arith.constant 0 : index
    %c0_65 = arith.constant 0 : index
    %203 = vector.load %arg6[%c0_64, %c0_65] : memref<8x128xf32, #tpu.memory_space<vmem>>, vector<8x128xf32>
    tpu.vector_store %arg6[%c0_64, %c0_65], %202 {strides = array<i32>} : memref<8x128xf32, #tpu.memory_space<vmem>>, vector<8x128xf32>,
    return
  }
  func.func @transform_0(%arg0: i32) -> (i32, i32, i32, i32) {
    %c0_i32 = arith.constant 0 : i32
    %c0_i32_0 = arith.constant 0 : i32
    %c0_i32_1 = arith.constant 0 : i32
    %c0_i32_2 = arith.constant 0 : i32
    return %arg0, %c0_i32, %c0_i32_0, %c0_i32_1 : i32, i32, i32, i32
  }
  func.func @transform_1(%arg0: i32) -> (i32, i32) {
    %c0_i32 = arith.constant 0 : i32
    %c0_i32_0 = arith.constant 0 : i32
    %c0_i32_1 = arith.constant 0 : i32
    return %c0_i32, %c0_i32_0 : i32, i32
  }
  func.func @transform_2(%arg0: i32) -> (i32, i32) {
    %c0_i32 = arith.constant 0 : i32
    %c0_i32_0 = arith.constant 0 : i32
    %c0_i32_1 = arith.constant 0 : i32
    return %c0_i32, %c0_i32_0 : i32, i32
  }
  func.func @transform_3(%arg0: i32) -> (i32, i32) {
    %c0_i32 = arith.constant 0 : i32
    %c0_i32_0 = arith.constant 0 : i32
    return %arg0, %c0_i32 : i32, i32
  }
  func.func @transform_4(%arg0: i32) -> (i32, i32) {
    %c0_i32 = arith.constant 0 : i32
    %c0_i32_0 = arith.constant 0 : i32
    return %arg0, %c0_i32 : i32, i32
  }
  func.func @transform_5(%arg0: i32) -> (i32, i32) {
    %c0_i32 = arith.constant 0 : i32
    %c0_i32_0 = arith.constant 0 : i32
    return %arg0, %c0_i32 : i32, i32
  }
}

</mosaic_0001>

<bundles_post_ra>
// kernel: tpu_custom_call.1
= control target key start
LH: loop header
LB: loop body
LE: loop exit
PB: predicated region body
PF: predicated region fallthrough
CT: control target
= control target key end

     0   :  { %11 = vsyncpa [#allocation3], 0  ;;  %s1056_s0 = inlined_call_operand.hbm [shape: f32[2,4,16,16], index: 0, kind: input, shape index: {}]   ;;  %s1057_s1 = inlined_call_operand.hbm [shape: f32[4,256], index: 1, kind: input, shape index: {}]   ;;  %s1058_s2 = inlined_call_operand.hbm [shape: f32[1,256], index: 2, kind: input, shape index: {}]   ;;  %s1059_s3 = inlined_call_operand.vmem [shape: s32[2,3], index: 3, kind: input, shape index: {}]   ;;  %s1060_s4 = inlined_call_operand.hbm [shape: f32[2,256], index: 4, kind: output, shape index: {0}]   ;;  %s1061_s5 = inlined_call_operand.hbm [shape: f32[8,128], index: 5, kind: output, shape index: {1}]  }
   0x1   :  { %12 = vsyncpa [#allocation6], 0 }
   0x2   :  { %13 = vsyncpa [#allocation4], 0  ;;  %s33_s20 = sshll.u32 %s1057_s1, 4  ;;  %s34_s20 = int_to_ptr.hbm [resolvable:$true] %s33_s20 }
   0x3   :  { %14 = vsyncpa [#allocation10], 0  ;;  %s793_s21 = smov [#allocation5]   ;;  %s19_s25 = sshll.u32 %s1056_s0, 4  ;;  %s20_s25 = int_to_ptr.hbm [resolvable:$true] %s19_s25 }
   0x4   :  { %s35_s22 = sshll.u32 %s793_s21, 4  ;;  %s794_s26 = smov [#allocation2]   ;;  %s36_s22 = int_to_ptr.vmem [resolvable:$true] %s35_s22 }
   0x5   :  { %38 = dma.hbm_to_vmem [thread:$0]  %s34_s20, 128, %s36_s22, [#allocation6]  }
   0x6   :  { %s21_s27 = sshll.u32 %s794_s26, 4  ;;  %s795_s28 = smov 128   ;;  %s22_s27 = int_to_ptr.vmem [resolvable:$true] %s21_s27 }
   0x7   :  { %s796_s29 = smov 8   ;;  %s44_s1 = sshll.u32 %s1058_s2, 4  ;;  %s45_s1 = int_to_ptr.hbm [resolvable:$true] %s44_s1 }
   0x8   :  { %27 = dma.hbm_to_vmem [thread:$0]  %s20_s25, 2048, %s22_s27, [#allocation3], %s795_s28, %s795_s28, %s796_s29  }
   0x9   :  { %s797_s7 = smov [#allocation7]  }
   0xa   :  { %s46_s8 = sshll.u32 %s797_s7, 4  ;;  %s47_s8 = int_to_ptr.vmem [resolvable:$true] %s46_s8 }
   0xb   :  { %49 = dma.hbm_to_vmem [thread:$0]  %s45_s1, 32, %s47_s8, [#allocation6]  }
   0xc   :  { %785 = dma.done.wait [#allocation3], 2048  }
   0xd   :  { %786 = vsyncadd [#allocation3], 4294965248 }
   0xe   :  { %787 = dma.done.wait [#allocation6], 160  }
   0xf   :  { %788 = vsyncadd [#allocation6], 4294967136  ;;  %vm80_vm0 = vcmask 130048   ;;  %v72_v0 = vld [vmem:[#allocation2 + $0x40] sm:$0xff]  ;;  %v66_v1 = vld [vmem:[#allocation2 + $0x10] sm:$0xff]  ;;  %v145_v40 = vlaneseq  ;;  %vm150_vm1 = vcmask 130112  }
  0x10   :  { %v64_v2 = vld [vmem:[#allocation2] sm:$0xff]  ;;  %v105_v3 = vsel %vm80_vm0, %v72_v0, 0.0  ;;  %v87_v4 = vsel %vm80_vm0, %v66_v1, 0.0  ;;  %v73_v6 = vld [vmem:[#allocation2 + $0x48] sm:$0xff]  ;;  %v67_v7 = vld [vmem:[#allocation2 + $0x18] sm:$0xff]  ;;  %vm173_vm2 = vcmask 1041409  }
  0x11   :  { %v81_v5 = vsel %vm80_vm0, %v64_v2, 0.0  ;;  %106 = vadd.xlane.f32.xlu2 %v105_v3  ;;  %88 = vadd.xlane.f32.xlu1 %v87_v4  ;;  %v65_v8 = vld [vmem:[#allocation2 + $0x8] sm:$0xff]  ;;  %v108_v9 = vsel %vm80_vm0, %v73_v6, 0.0  ;;  %v90_v10 = vsel %vm80_vm0, %v67_v7, 0.0  ;;  %v68_v12 = vld [vmem:[#allocation2 + $0x20] sm:$0xff]  ;;  %v75_v13 = vld [vmem:[#allocation2 + $0x58] sm:$0xff] }
  0x12   :  { %82 = vadd.xlane.f32.xlu0 %v81_v5  ;;  %v84_v11 = vsel %vm80_vm0, %v65_v8, 0.0  ;;  %v74_v14 = vld [vmem:[#allocation2 + $0x50] sm:$0xff]  ;;  %v93_v15 = vsel %vm80_vm0, %v68_v12, 0.0  ;;  %v114_v16 = vsel %vm80_vm0, %v75_v13, 0.0  ;;  %v77_v18 = vld [vmem:[#allocation2 + $0x68] sm:$0xff]  ;;  %v76_v19 = vld [vmem:[#allocation2 + $0x60] sm:$0xff] }
  0x13   :  { %v111_v17 = vsel %vm80_vm0, %v74_v14, 0.0  ;;  %v69_v20 = vld [vmem:[#allocation2 + $0x28] sm:$0xff]  ;;  %v120_v21 = vsel %vm80_vm0, %v77_v18, 0.0  ;;  %v117_v22 = vsel %vm80_vm0, %v76_v19, 0.0  ;;  %v71_v24 = vld [vmem:[#allocation2 + $0x38] sm:$0xff]  ;;  %v78_v25 = vld [vmem:[#allocation2 + $0x70] sm:$0xff] }
  0x14   :  { %v96_v23 = vsel %vm80_vm0, %v69_v20, 0.0  ;;  %v70_v26 = vld [vmem:[#allocation2 + $0x30] sm:$0xff]  ;;  %v102_v27 = vsel %vm80_vm0, %v71_v24, 0.0  ;;  %v123_v28 = vsel %vm80_vm0, %v78_v25, 0.0  ;;  %v79_v30 = vld [vmem:[#allocation2 + $0x78] sm:$0xff]  ;;  %v862_v42 = vand.u32 127, %v145_v40 }
  0x15   :  { %v99_v29 = vsel %vm80_vm0, %v70_v26, 0.0  ;;  %v126_v31 = vsel %vm80_vm0, %v79_v30, 0.0  ;;  %vm175_vm3 = vcmask 1042434   ;;  %vm177_vm4 = vcmask 1043459   ;;  %v193_v19 = vld [vmem:[#allocation5] sm:$0xff]  ;;  %s803_s9 = smov 127  }
  0x16   :  { %v148_v43 = vadd.s32 4294967288, %v862_v42  ;;  %vm184_vm5 = vcmask 125952   ;;  %206 = vst [vmem:[#allocation1] ss:$2 sm:$0xff] %v193_v19  ;;  %vm212_vm6 = vcmask 1043456   ;;  %vm209_vm7 = vcmask 31744  }
  0x17   :  { %vm260_vm13 = vcmask 1041408   ;;  %s587_s12 = sshll.u32 %s1060_s4, 4  ;;  %s804_s13 = smov [#allocation8]   ;;  %s588_s12 = int_to_ptr.hbm [resolvable:$true] %s587_s12 }
  0x18   :  { %s585_s14 = sshll.u32 %s804_s13, 4  ;;  %s805_s20 = smov [#allocation9]   ;;  %s586_s14 = int_to_ptr.vmem [resolvable:$true] %s585_s14 }
  0x19   :  { %109 = vadd.xlane.f32.xlu2 %v108_v9  ;;  %91 = vadd.xlane.f32.xlu1 %v90_v10  ;;  %s596_s21 = sshll.u32 %s805_s20, 4  ;;  %s598_s25 = sshll.u32 %s1061_s5, 4  ;;  %s597_s21 = int_to_ptr.vmem [resolvable:$true] %s596_s21  ;;  %s599_s25 = int_to_ptr.hbm [resolvable:$true] %s598_s25 }
  0x1a   :  { %85 = vadd.xlane.f32.xlu0 %v84_v11 }
  0x1d   :  { %v207_v20 = vld.sshfl [vmem:[#allocation1] sm:$0xff pattern:$0x75316420] }
  0x1e   :  { %614 = vmatpush.msk.msra.mxu0 %vm212_vm6, %v207_v20 }
  0x21   :  { %94 = vadd.xlane.f32.xlu2 %v93_v15  ;;  %115 = vadd.xlane.f32.xlu1 %v114_v16 }
  0x22   :  { %112 = vadd.xlane.f32.xlu0 %v111_v17 }
  0x29   :  { %121 = vadd.xlane.f32.xlu2 %v120_v21  ;;  %118 = vadd.xlane.f32.xlu1 %v117_v22  ;;  %v208_v21 = vld.sshfl [vmem:[#allocation1 + $0x8] sm:$0xff pattern:$0x75316420] }
  0x2a   :  { %97 = vadd.xlane.f32.xlu0 %v96_v23  ;;  %616 = vmatpush.msk.msra.mxu1 %vm212_vm6, %v208_v21 }
  0x31   :  { %103 = vadd.xlane.f32.xlu1 %v102_v27  ;;  %124 = vadd.xlane.f32.xlu2 %v123_v28  ;;  %v798_v27 = vmov 2   ;;  %v894_v28 = vadd.s32 128, %v862_v42 }
  0x32   :  { %100 = vadd.xlane.f32.xlu0 %v99_v29  ;;  %649 = vset.pattern.permute.xlu2 %v798_v27  ;;  %v194_v29 = vld [vmem:[#allocation7] sm:$0x3] }
  0x33   :  { %vm455_vm8 = vcmp.ge.s32.totalorder %v894_v28, 179  ;;  %vm457_vm9 = vcmp.lt.s32.totalorder %v894_v28, 186  ;;  %v196_v30 = vperm.slane %v194_v29, 0  ;;  %vm362_vm10 = vcmp.ge.s32.totalorder %v894_v28, 168 }
  0x34   :  { %vm364_vm11 = vcmp.lt.s32.totalorder %v894_v28, 179  ;;  %vm900_vm12 = vmand %vm455_vm8, %vm457_vm9  ;;  %vm275_vm15 = vcmp.lt.s32.totalorder %v894_v28, 168 }
  0x35   :  { %vm904_vm14 = vmand %vm362_vm10, %vm364_vm11 }
  0x3a   :  { %127 = vadd.xlane.f32.xlu0 %v126_v31  ;;  %v197_v31 = vperm.slane %v194_v29, 1 }
  0x84   :  { %v107_v32 = vpop.xlane.xlu2 %106  ;;  %v89_v33 = vpop.xlane.xlu1 %88 }
  0x85   :  { %v83_v34 = vpop.xlane.xlu0 %82  ;;  %v152_v46 = vperm.slane %v89_v33, %v862_v42  ;;  %v161_v5 = vperm.slane %v107_v32, %v862_v42 }
  0x86   :  { %v147_v52 = vperm.slane %v83_v34, %v862_v42 }
  0x8c   :  { %v92_v35 = vpop.xlane.xlu1 %91  ;;  %v110_v36 = vpop.xlane.xlu2 %109 }
  0x8d   :  { %v86_v37 = vpop.xlane.xlu0 %85  ;;  %v153_v47 = vperm.slane %v92_v35, %v148_v43  ;;  %v162_v6 = vperm.slane %v110_v36, %v148_v43 }
  0x8e   :  { %v149_v48 = vperm.slane %v86_v37, %v148_v43 }
  0x8f   :  { %v154_v53 = vsel %vm150_vm1, %v153_v47, %v152_v46  ;;  %v163_v12 = vsel %vm150_vm1, %v162_v6, %v161_v5 }
  0x90   :  { %v151_v54 = vsel %vm150_vm1, %v149_v48, %v147_v52  ;;  %v799_v52 = vmov 0  }
  0x91   :  { %v174_v60 = vsel %vm173_vm2, %v154_v53, %v151_v54  ;;  %647 = vset.pattern.permute.xlu0 %v799_v52 }
  0x94   :  { %v116_v38 = vpop.xlane.xlu1 %115  ;;  %v95_v41 = vpop.xlane.xlu2 %94 }
  0x95   :  { %v113_v39 = vpop.xlane.xlu0 %112  ;;  %v155_v49 = vperm.slane %v95_v41, %v862_v42  ;;  %v165_v61 = vperm.slane %v116_v38, %v148_v43 }
  0x96   :  { %v164_v62 = vperm.slane %v113_v39, %v862_v42 }
  0x98   :  { %v166_v8 = vsel %vm150_vm1, %v165_v61, %v164_v62 }
  0x99   :  { %v179_v14 = vsel %vm173_vm2, %v166_v8, %v163_v12 }
  0x9c   :  { %v119_v44 = vpop.xlane.xlu1 %118  ;;  %v122_v50 = vpop.xlane.xlu2 %121 }
  0x9d   :  { %v98_v45 = vpop.xlane.xlu0 %97  ;;  %v168_v1 = vperm.slane %v122_v50, %v148_v43  ;;  %v167_v2 = vperm.slane %v119_v44, %v862_v42  ;;  %v933_v50 = vld [vmem:[%s1059_s3] sm:$0x3]  ;;  %s802_s3 = smov 126  }
  0x9e   :  { %v156_v51 = vperm.slane %v98_v45, %v148_v43  ;;  %v982_v19 = vadd.s32 168, %v933_v50 }
  0x9f   :  { %v169_v10 = vsel %vm150_vm1, %v168_v1, %v167_v2 }
  0xa0   :  { %v157_v56 = vsel %vm150_vm1, %v156_v51, %v155_v49  ;;  %v180_v16 = vsel %vm175_vm3, %v169_v10, %v179_v14  ;;  %v936_v51 = vadd.s32 179, %v933_v50  ;;  %v800_v10 = vmov 1  }
  0xa1   :  { %v176_v0 = vsel %vm175_vm3, %v157_v56, %v174_v60  ;;  %648 = vset.pattern.permute.xlu1 %v800_v10 }
  0xa4   :  { %v104_v55 = vpop.xlane.xlu1 %103  ;;  %v125_v4 = vpop.xlane.xlu2 %124 }
  0xa5   :  { %v159_v57 = vperm.slane %v104_v55, %v148_v43  ;;  %v101_v58 = vpop.xlane.xlu0 %100  ;;  %v170_v9 = vperm.slane %v125_v4, %v862_v42 }
  0xa6   :  { %v158_v59 = vperm.slane %v101_v58, %v862_v42 }
  0xa8   :  { %v160_v63 = vsel %vm150_vm1, %v159_v57, %v158_v59 }
  0xa9   :  { %v178_v3 = vsel %vm177_vm4, %v160_v63, %v176_v0 }
  0xaa   :  { %v185_v7 = vsel %vm184_vm5, %v178_v3, 0.0 }
  0xab   :  { %186 = vadd.xlane.f32.xlu1 %v185_v7 }
  0xad   :  { %v128_v11 = vpop.xlane.xlu0 %127 }
  0xae   :  { %v171_v13 = vperm.slane %v128_v11, %v148_v43 }
  0xb0   :  { %v172_v15 = vsel %vm150_vm1, %v171_v13, %v170_v9 }
  0xb1   :  { %v181_v17 = vsel %vm177_vm4, %v172_v15, %v180_v16 }
  0xb2   :  { %v188_v18 = vsel %vm184_vm5, %v181_v17, 0.0 }
  0xb3   :  { %189 = vadd.xlane.f32.xlu2 %v188_v18 }
 0x11e   :  { %v187_v22 = vpop.xlane.xlu1 %186 }
 0x11f   :  { %v202_v24 = vperm.slane %v187_v22, %v862_v42 }
 0x126   :  { %v190_v23 = vpop.xlane.xlu2 %189 }
 0x127   :  { %v203_v25 = vperm.slane %v190_v23, %v862_v42 }
 0x129   :  { %v204_v26 = vsel %vm173_vm2, %v203_v25, %v202_v24 }
 0x12a   :  { %615 = vmatmul.msk.f32.vlgmr.msra.gmra.mxu0 %vm209_vm7, %v204_v26  ;;  %617 = vmatmul.msk.f32.vlgmr.msra.gmra.mxu1 %vm209_vm7, %v204_v26 }
 0x1a7   :  { %v234_v33 = vpop.f32.mrf.mxu0  ;;  %v254_v34 = vpop.f32.mrf.mxu1 }
 0x1a8   :  { %v909_v36 = vadd.f32 %v234_v33, %v196_v30  ;;  %v911_v37 = vadd.f32 %v254_v34, %v197_v31 }
 0x1aa   :  { %v461_v38 = vsel %vm900_vm12, %v911_v37, -inf  ;;  %v368_v39 = vsel %vm904_vm14, %v911_v37, -inf  ;;  %v279_v41 = vsel %vm275_vm15, %v911_v37, -inf  ;;  %v280_v43 = vsel %vm260_vm13, %v909_v36, -inf }
 0x1ab   :  { %v463_v44 = vsel %vm260_vm13, %v461_v38, -inf  ;;  %v370_v45 = vsel %vm260_vm13, %v368_v39, -inf  ;;  %v281_v46 = vsel %vm260_vm13, %v279_v41, -inf  ;;  %v259_v47 = vrot.slane %v911_v37, 6 }
 0x1ac   :  { %465 = vmax.xlane.f32.xlu1 %v463_v44  ;;  %372 = vmax.xlane.f32.xlu0 %v370_v45  ;;  %v282_v48 = vmax.f32 %v280_v43, %v281_v46 }
 0x1ad   :  { %v261_v49 = vsel %vm260_vm13, %v909_v36, %v259_v47 }
 0x1ae   :  { %283 = vmax.xlane.f32.xlu2 %v282_v48  ;;  %263 = vst [vmem:[#allocation8] sm:$0xf] %v261_v49 }
 0x1af   :  { %590 = dma.vmem_to_hbm [thread:$0]  %s586_s14, 64, %s588_s12, [#allocation4]  }
 0x1c6   :  { %485 = vperm.xlu2 %649, %v936_v51  }
 0x21f   :  { %v939_v53 = vpop.xlane.xlu1 %465  ;;  %v941_v54 = vpop.xlane.xlu0 %372 }
 0x220   :  { %vm619_vm0 = vcmp.eq.f32.partialorder %v939_v53, -inf  ;;  %vm509_vm1 = vcmp.eq.f32.partialorder %v461_v38, %v939_v53  ;;  %vm618_vm2 = vcmp.eq.f32.partialorder %v941_v54, -inf  ;;  %vm416_vm3 = vcmp.eq.f32.partialorder %v368_v39, %v941_v54 }
 0x221   :  { %v510_v55 = vsel %vm619_vm0, %v862_v42, 256  ;;  %v511_v56 = vsel %vm509_vm1, %v894_v28, 256  ;;  %v375_v57 = vsub.f32 %v911_v37, %v941_v54  ;;  %v951_v58 = vpop.xlane.xlu2 %283  ;;  %v417_v61 = vsel %vm618_vm2, %v862_v42, 256 }
 0x222   :  { %v512_v59 = vsel %vm260_vm13, %v510_v55, 2147483647  ;;  %v513_v60 = vsel %vm260_vm13, %v511_v56, 2147483647  ;;  %v418_v62 = vsel %vm416_vm3, %v894_v28, 256  ;;  %vm326_vm6 = vcmp.eq.f32.partialorder %v909_v36, %v951_v58 }
 0x223   :  { %vm514_vm4 = vcmp.lt.s32.totalorder %v512_v59, %v513_v60  ;;  %v419_v0 = vsel %vm260_vm13, %v417_v61, 2147483647  ;;  %v420_v1 = vsel %vm260_vm13, %v418_v62, 2147483647  ;;  %v378_v2 = vmul.f32 1.442695, %v375_v57 }
 0x224   :  { %v957_v63 = vsel %vm514_vm4, %v512_v59, %v513_v60  ;;  %vm421_vm5 = vcmp.lt.s32.totalorder %v419_v0, %v420_v1  ;;  %vm327_vm7 = vcmp.eq.f32.partialorder %v279_v41, %v951_v58  ;;  %v328_v5 = vsel %vm326_vm6, %v862_v42, 256 }
 0x225   :  { %v517_v3 = vshra.s32 %v957_v63, 16  ;;  %v964_v4 = vsel %vm421_vm5, %v419_v0, %v420_v1  ;;  %v329_v8 = vsel %vm327_vm7, %v894_v28, 256  ;;  %v330_v9 = vsel %vm260_vm13, %v328_v5, 2147483647 }
 0x226   :  { %v424_v7 = vshra.s32 %v964_v4, 16  ;;  %v331_v11 = vsel %vm260_vm13, %v329_v8, 2147483647  ;;  %651 = vpow2.f32 %v378_v2  ;;  %v286_v20 = vsub.f32 %v911_v37, %v951_v58 }
 0x227   :  { %v519_v6 = vcvt.s32.f32 %v517_v3  ;;  %vm332_vm8 = vcmp.lt.s32.totalorder %v330_v9, %v331_v11  ;;  %v285_v21 = vsub.f32 %v909_v36, %v951_v58  ;;  %v468_v23 = vsub.f32 %v911_v37, %v939_v53 }
 0x228   :  { %v426_v12 = vcvt.s32.f32 %v424_v7  ;;  %v972_v13 = vsel %vm332_vm8, %v330_v9, %v331_v11  ;;  %v289_v22 = vmul.f32 1.442695, %v286_v20  ;;  %v516_v47 = vand.u32 65535, %v957_v63 }
 0x229   :  { %520 = vmin.xlane.f32.xlu1 %v519_v6  ;;  %v335_v14 = vshra.s32 %v972_v13, 16  ;;  %v287_v24 = vmul.f32 1.442695, %v285_v21  ;;  %v471_v25 = vmul.f32 1.442695, %v468_v23  ;;  %v486_v30 = vpop.permute.xlu2 %485  ;;  %v423_v48 = vand.u32 65535, %v964_v4 }
 0x22a   :  { %427 = vmin.xlane.f32.xlu0 %v426_v12  ;;  %653 = vpow2.f32 %v289_v22  ;;  %vm487_vm9 = vcmp.eq.s32.totalorder %v862_v42, %v486_v30  ;;  %vm488_vm10 = vcmp.eq.s32.totalorder %v894_v28, %v486_v30  ;;  %v518_v49 = vcvt.s32.f32 %v516_v47 }
 0x22b   :  { %v975_v15 = vcvt.s32.f32 %v335_v14  ;;  %655 = vpow2.f32 %v287_v24  ;;  %v489_v39 = vsel %vm487_vm9, %v909_v36, 0.0  ;;  %v490_v41 = vsel %vm488_vm10, %v911_v37, 0.0 }
 0x22c   :  { %v652_v16 = vpop.eup %651  ;;  %657 = vpow2.f32 %v471_v25  ;;  %v491_v44 = vsel %vm260_vm13, %v489_v39, 0.0  ;;  %v492_v45 = vsel %vm260_vm13, %v490_v41, 0.0  ;;  %v425_v56 = vcvt.s32.f32 %v423_v48 }
 0x22d   :  { %338 = vmin.xlane.f32.xlu2 %v975_v15  ;;  %v381_v17 = vsel %vm904_vm14, %v652_v16, 0.0  ;;  %v493_v46 = vadd.f32 %v492_v45, %v491_v44  ;;  %v334_v8 = vand.u32 65535, %v972_v13  ;;  %vm315_vm7 = vcmask 1024  }
 0x22e   :  { %v383_v18 = vsel %vm260_vm13, %v381_v17, 0.0  ;;  %v267_v17 = vshrl.u32 %v145_v40, 7  ;;  %vm558_vm10 = vcmp.eq.s32.totalorder %v862_v42, 0 }
 0x22f   :  { %v336_v9 = vcvt.s32.f32 %v334_v8 }
 0x230   :  { %v654_v26 = vpop.eup %653 }
 0x231   :  { %v656_v29 = vpop.eup %655 }
 0x232   :  { %v293_v31 = vsel %vm260_vm13, %v656_v29, 0.0  ;;  %v658_v34 = vpop.eup %657 }
 0x233   :  { %v474_v38 = vsel %vm900_vm12, %v658_v34, 0.0 }
 0x234   :  { %v476_v43 = vsel %vm260_vm13, %v474_v38, 0.0 }
 0x235   :  { %385 = vadd.xlane.f32.xlu2 %v383_v18 }
 0x23e   :  { %302 = vperm.xlu0 %647, %v933_v50  }
 0x242   :  { %392 = vperm.xlu1 %648, %v982_v19  }
 0x246   :  { %650 = vset.pattern.permute.xlu0 %v798_v27  ;;  %v292_v27 = vsel %vm275_vm15, %v654_v26, 0.0 }
 0x247   :  { %v294_v33 = vsel %vm260_vm13, %v292_v27, 0.0 }
 0x248   :  { %v295_v35 = vadd.f32 %v294_v33, %v293_v31 }
 0x268   :  { %296 = vadd.xlane.f32.xlu0 %v295_v35 }
 0x26c   :  { %478 = vadd.xlane.f32.xlu1 %v476_v43 }
 0x270   :  { %494 = vadd.xlane.f32.xlu0 %v493_v46 }
 0x29c   :  { %v521_v32 = vpop.xlane.xlu1 %520 }
 0x29d   :  { %vm522_vm11 = vcmp.eq.f32.partialorder %v519_v6, %v521_v32  ;;  %v428_v52 = vpop.xlane.xlu0 %427 }
 0x29e   :  { %v523_v55 = vsel %vm522_vm11, %v518_v49, inf  ;;  %vm429_vm12 = vcmp.eq.f32.partialorder %v426_v12, %v428_v52  ;;  %v434_v12 = vcvt.f32.s32 %v428_v52  ;;  %vm561_vm11 = vcmp.eq.s32.totalorder %v862_v42, 1 }
 0x29f   :  { %524 = vmin.xlane.f32.xlu1 %v523_v55  ;;  %v430_v57 = vsel %vm429_vm12, %v425_v56, inf  ;;  %vm564_vm12 = vcmp.eq.s32.totalorder %v862_v42, 2 }
 0x2a0   :  { %431 = vmin.xlane.f32.xlu2 %v430_v57  ;;  %v339_v7 = vpop.xlane.xlu2 %338  ;;  %v435_v20 = vshll.u32 %v434_v12, 16 }
 0x2a1   :  { %vm340_vm2 = vcmp.eq.f32.partialorder %v975_v15, %v339_v7  ;;  %v801_v15 = vmov 0.0   ;;  %v345_v41 = vcvt.f32.s32 %v339_v7 }
 0x2a2   :  { %v341_v10 = vsel %vm340_vm2, %v336_v9, inf }
 0x2a8   :  { %v386_v11 = vpop.xlane.xlu2 %385 }
 0x2b0   :  { %v303_v59 = vpop.permute.xlu0 %302 }
 0x2b1   :  { %vm304_vm14 = vcmp.eq.s32.totalorder %v862_v42, %v303_v59  ;;  %vm305_vm15 = vcmp.eq.s32.totalorder %v894_v28, %v303_v59 }
 0x2b2   :  { %v306_v60 = vsel %vm304_vm14, %v909_v36, 0.0  ;;  %v307_v61 = vsel %vm305_vm15, %v911_v37, 0.0  ;;  %vm567_vm14 = vcmp.eq.s32.totalorder %v862_v42, 3  ;;  %vm570_vm15 = vcmp.eq.s32.totalorder %v862_v42, 4 }
 0x2b3   :  { %v308_v63 = vsel %vm260_vm13, %v306_v60, 0.0  ;;  %v309_v0 = vsel %vm260_vm13, %v307_v61, 0.0 }
 0x2b4   :  { %v393_v62 = vpop.permute.xlu1 %392  ;;  %v310_v1 = vadd.f32 %v309_v0, %v308_v63 }
 0x2b5   :  { %vm394_vm0 = vcmp.eq.s32.totalorder %v862_v42, %v393_v62  ;;  %vm395_vm1 = vcmp.eq.s32.totalorder %v894_v28, %v393_v62 }
 0x2b6   :  { %v396_v2 = vsel %vm394_vm0, %v909_v36, 0.0  ;;  %v397_v3 = vsel %vm395_vm1, %v911_v37, 0.0  ;;  %311 = vadd.xlane.f32.xlu1 %v310_v1  ;;  %v527_v36 = vcvt.f32.s32 %v521_v32  ;;  %vm573_vm0 = vcmp.eq.s32.totalorder %v862_v42, 5 }
 0x2b7   :  { %v398_v4 = vsel %vm260_vm13, %v396_v2, 0.0  ;;  %v399_v5 = vsel %vm260_vm13, %v397_v3, 0.0  ;;  %vm271_vm13 = vcmp.lt.s32.totalorder %v267_v17, 2  ;;  %vm576_vm1 = vcmp.eq.s32.totalorder %v862_v42, 6 }
 0x2b8   :  { %v400_v6 = vadd.f32 %v399_v5, %v398_v4  ;;  %v528_v14 = vshll.u32 %v527_v36, 16  ;;  %v547_v60 = vsel %vm271_vm13, 1.0, %v801_v15 }
 0x2ba   :  { %401 = vadd.xlane.f32.xlu2 %v400_v6 }
 0x2c2   :  { %342 = vmin.xlane.f32.xlu2 %v341_v10 }
 0x2db   :  { %v297_v13 = vpop.xlane.xlu0 %296 }
 0x2dc   :  { %659 = vlog2.f32 %v297_v13 }
 0x2dd   :  { %661 = vlog2.f32 %v386_v11 }
 0x2df   :  { %v479_v28 = vpop.xlane.xlu1 %478 }
 0x2e0   :  { %663 = vlog2.f32 %v479_v28 }
 0x2e2   :  { %v660_v25 = vpop.eup %659 }
 0x2e3   :  { %v299_v26 = vmul.f32 0.6931472, %v660_v25  ;;  %v662_v29 = vpop.eup %661 }
 0x2e5   :  { %v300_v27 = vadd.f32 %v299_v26, %v951_v58  ;;  %v346_v58 = vshll.u32 %v345_v41, 16 }
 0x2e6   :  { %v664_v39 = vpop.eup %663 }
 0x2e7   :  { %v481_v43 = vmul.f32 0.6931472, %v664_v39 }
 0x2e9   :  { %v482_v48 = vadd.f32 %v481_v43, %v939_v53 }
 0x312   :  { %v525_v37 = vpop.xlane.xlu1 %524 }
 0x313   :  { %v526_v16 = vcvt.f32.s32 %v525_v37  ;;  %v432_v18 = vpop.xlane.xlu2 %431 }
 0x314   :  { %v433_v22 = vcvt.f32.s32 %v432_v18 }
 0x315   :  { %v529_v21 = vadd.s32 %v528_v14, %v526_v16 }
 0x316   :  { %v436_v23 = vadd.s32 %v435_v20, %v433_v22 }
 0x317   :  { %vm530_vm3 = vcmp.eq.s32.totalorder %v529_v21, %v936_v51  ;;  %v388_v51 = vmul.f32 0.6931472, %v662_v29 }
 0x318   :  { %vm531_vm4 = vmand %vm271_vm13, %vm530_vm3  ;;  %vm437_vm5 = vcmp.eq.s32.totalorder %v436_v23, %v982_v19 }
 0x319   :  { %v532_v24 = vsel %vm531_vm4, 1.0, %v801_v15  ;;  %vm438_vm6 = vmand %vm271_vm13, %vm437_vm5  ;;  %v389_v33 = vadd.f32 %v388_v51, %v941_v54  ;;  %v495_v54 = vpop.xlane.xlu0 %494 }
 0x31a   :  { %534 = vrot.lane.b32.xlu2 %v532_v24, %s802_s3  ;;  %v439_v40 = vsel %vm438_vm6, 1.0, %v801_v15  ;;  %v496_v49 = vsub.f32 %v482_v48, %v495_v54 }
 0x31b   :  { %441 = vrot.lane.b32.xlu1 %v439_v40, %s803_s9 }
 0x31c   :  { %v497_v56 = vsel %vm271_vm13, %v496_v49, 0.0 }
 0x31d   :  { %v498_v57 = vsel %vm315_vm7, %v497_v56, 0.0 }
 0x329   :  { %v312_v30 = vpop.xlane.xlu1 %311 }
 0x32a   :  { %v313_v31 = vsub.f32 %v300_v27, %v312_v30 }
 0x32c   :  { %v314_v19 = vsel %vm271_vm13, %v313_v31, 0.0 }
 0x32d   :  { %v402_v34 = vpop.xlane.xlu2 %401  ;;  %v316_v35 = vsel %vm315_vm7, %v314_v19, 0.0 }
 0x32e   :  { %317 = vadd.xlane.f32.xlu0 %v316_v35  ;;  %v403_v38 = vsub.f32 %v389_v33, %v402_v34 }
 0x330   :  { %v404_v44 = vsel %vm271_vm13, %v403_v38, 0.0 }
 0x331   :  { %v405_v46 = vsel %vm315_vm7, %v404_v44, 0.0 }
 0x335   :  { %v343_v45 = vpop.xlane.xlu2 %342 }
 0x336   :  { %v344_v47 = vcvt.f32.s32 %v343_v45  ;;  %406 = vadd.xlane.f32.xlu0 %v405_v46 }
 0x338   :  { %v347_v32 = vadd.s32 %v346_v58, %v344_v47 }
 0x33a   :  { %vm348_vm8 = vcmp.eq.s32.totalorder %v347_v32, %v933_v50  ;;  %v548_v50 = vsel %vm315_vm7, %v547_v60, 0.0 }
 0x33b   :  { %vm349_vm9 = vmand %vm271_vm13, %vm348_vm8 }
 0x33c   :  { %v350_v52 = vsel %vm349_vm9, 1.0, %v801_v15 }
 0x33d   :  { %v351_v55 = vsel %vm315_vm7, %v350_v52, 0.0 }
 0x33e   :  { %352 = vadd.xlane.f32.xlu0 %v351_v55 }
 0x343   :  { %499 = vadd.xlane.f32.xlu2 %v498_v57 }
 0x374   :  { %v535_v59 = vpop.permute.xlu2 %534 }
 0x375   :  { %v537_v53 = vsel %vm315_vm7, %v535_v59, 0.0 }
 0x376   :  { %538 = vadd.xlane.f32.xlu0 %v537_v53 }
 0x37e   :  { %549 = vadd.xlane.f32.xlu0 %v548_v50 }
 0x38d   :  { %v442_v61 = vpop.permute.xlu1 %441 }
 0x38e   :  { %v444_v62 = vsel %vm315_vm7, %v442_v61, 0.0 }
 0x38f   :  { %445 = vadd.xlane.f32.xlu1 %v444_v62 }
 0x3a1   :  { %v318_v63 = vpop.xlane.xlu0 %317 }
 0x3a2   :  { %v319_v0 = vrot.slane %v318_v63, 4 }
 0x3a4   :  { %v320_v1 = vadd.f32 %v319_v0, %v318_v63 }
 0x3a6   :  { %v321_v2 = vrot.slane %v320_v1, 2 }
 0x3a8   :  { %v322_v3 = vadd.f32 %v321_v2, %v320_v1 }
 0x3a9   :  { %v407_v4 = vpop.xlane.xlu0 %406 }
 0x3aa   :  { %v408_v5 = vrot.slane %v407_v4, 4  ;;  %v323_v6 = vrot.slane %v322_v3, 1 }
 0x3ac   :  { %v324_v7 = vadd.f32 %v323_v6, %v322_v3  ;;  %v409_v8 = vadd.f32 %v408_v5, %v407_v4 }
 0x3ae   :  { %620 = vpush %v324_v7  ;;  %v410_v9 = vrot.slane %v409_v8, 2 }
 0x3b0   :  { %v411_v36 = vadd.f32 %v410_v9, %v409_v8 }
 0x3b1   :  { %v353_v10 = vpop.xlane.xlu0 %352 }
 0x3b2   :  { %v354_v28 = vrot.slane %v353_v10, 4  ;;  %v412_v14 = vrot.slane %v411_v36, 1 }
 0x3b4   :  { %v355_v11 = vadd.f32 %v354_v28, %v353_v10  ;;  %v413_v18 = vadd.f32 %v412_v14, %v411_v36 }
 0x3b6   :  { %v356_v12 = vrot.slane %v355_v11, 2  ;;  %v500_v21 = vpop.xlane.xlu2 %499 }
 0x3b7   :  { %v501_v23 = vrot.slane %v500_v21, 4 }
 0x3b8   :  { %v357_v37 = vadd.f32 %v356_v12, %v355_v11 }
 0x3b9   :  { %v502_v24 = vadd.f32 %v501_v23, %v500_v21 }
 0x3ba   :  { %v358_v16 = vrot.slane %v357_v37, 1 }
 0x3bb   :  { %v503_v26 = vrot.slane %v502_v24, 2 }
 0x3bc   :  { %v359_v17 = vadd.f32 %v358_v16, %v357_v37 }
 0x3bd   :  { %v504_v19 = vadd.f32 %v503_v26, %v502_v24 }
 0x3be   :  { %622 = vpush %v359_v17 }
 0x3bf   :  { %624 = vpush %v413_v18  ;;  %v505_v39 = vrot.slane %v504_v19, 1 }
 0x3c1   :  { %v506_v58 = vadd.f32 %v505_v39, %v504_v19 }
 0x3df   :  { %s621_s4 = spop %620 }
 0x3e0   :  { %v559_v48 = vstv %s621_s4 }
 0x3e1   :  { %v560_v54 = vsel %vm558_vm10, %v559_v48, 0.0 }
 0x3e9   :  { %v539_v20 = vpop.xlane.xlu0 %538 }
 0x3ea   :  { %v540_v13 = vrot.slane %v539_v20, 4 }
 0x3ec   :  { %v541_v40 = vadd.f32 %v540_v13, %v539_v20 }
 0x3ee   :  { %v542_v51 = vrot.slane %v541_v40, 2 }
 0x3ef   :  { %s623_s15 = spop %622 }
 0x3f0   :  { %v543_v34 = vadd.f32 %v542_v51, %v541_v40  ;;  %s625_s16 = spop %624  ;;  %v568_v55 = vstv %s623_s15 }
 0x3f1   :  { %v550_v22 = vpop.xlane.xlu0 %549  ;;  %v562_v32 = vstv %s625_s16 }
 0x3f2   :  { %v551_v15 = vrot.slane %v550_v22, 4  ;;  %v544_v43 = vrot.slane %v543_v34, 1  ;;  %v563_v49 = vsel %vm561_vm11, %v562_v32, %v560_v54 }
 0x3f4   :  { %v552_v25 = vadd.f32 %v551_v15, %v550_v22  ;;  %v545_v46 = vadd.f32 %v544_v43, %v543_v34 }
 0x3f6   :  { %v553_v30 = vrot.slane %v552_v25, 2 }
 0x3f8   :  { %v554_v35 = vadd.f32 %v553_v30, %v552_v25 }
 0x3fa   :  { %v555_v44 = vrot.slane %v554_v35, 1 }
 0x3fc   :  { %v556_v47 = vadd.f32 %v555_v44, %v554_v35 }
 0x402   :  { %v446_v29 = vpop.xlane.xlu1 %445 }
 0x403   :  { %v447_v27 = vrot.slane %v446_v29, 4 }
 0x405   :  { %v448_v31 = vadd.f32 %v447_v27, %v446_v29 }
 0x407   :  { %v449_v33 = vrot.slane %v448_v31, 2 }
 0x409   :  { %v450_v38 = vadd.f32 %v449_v33, %v448_v31 }
 0x40b   :  { %v451_v41 = vrot.slane %v450_v38, 1 }
 0x40d   :  { %v452_v45 = vadd.f32 %v451_v41, %v450_v38 }
 0x40f   :  { %626 = vpush %v452_v45 }
 0x410   :  { %628 = vpush %v506_v58 }
 0x411   :  { %630 = vpush %v545_v46 }
 0x412   :  { %632 = vpush %v556_v47 }
 0x440   :  { %s627_s17 = spop %626 }
 0x441   :  { %s629_s18 = spop %628  ;;  %v571_v57 = vstv %s627_s17 }
 0x442   :  { %v565_v52 = vstv %s629_s18  ;;  %s631_s19 = spop %630 }
 0x443   :  { %v566_v56 = vsel %vm564_vm12, %v565_v52, %v563_v49  ;;  %s633_s22 = spop %632  ;;  %v574_v60 = vstv %s631_s19 }
 0x444   :  { %v569_v59 = vsel %vm567_vm14, %v568_v55, %v566_v56  ;;  %v577_v61 = vstv %s633_s22 }
 0x445   :  { %v572_v53 = vsel %vm570_vm15, %v571_v57, %v569_v59 }
 0x446   :  { %v575_v50 = vsel %vm573_vm0, %v574_v60, %v572_v53 }
 0x447   :  { %v578_v62 = vsel %vm576_vm1, %v577_v61, %v575_v50 }
 0x448   :  { %579 = vst [vmem:[#allocation9] sm:$0xff] %v578_v62 }
 0x449   :  { %601 = dma.vmem_to_hbm [thread:$0]  %s597_s21, 128, %s599_s25, [#allocation10]  }
 0x44a   :  { %789 = dma.done.wait [#allocation4], 64  }
 0x44b   :  { %790 = vsyncadd [#allocation4], 4294967232 }
 0x44c   :  { %791 = dma.done.wait [#allocation10], 128  }
 0x44d   :  { %792 = vsyncadd [#allocation10], 4294967168 }
 0x44e   :  { %610 = vsyncpa [#allocation3], 1 }
 0x44f   :  { %611 = vsyncpa [#allocation6], 1 }
 0x450   :  { %612 = vsyncpa [#allocation4], 1 }
 0x451   :  { %613 = vsyncpa [#allocation10], 1 }

</bundles_post_ra>
